<compile_context>
chip_gen: v7x
topology: tpu7x:2x2x1
jax: 0.10.0
libtpu: 0.0.40
codegen_flags: <defaults>
</compile_context>

<pallas_src>
import jax
import jax.numpy as jnp
from jax.experimental import pallas as pl
from jax.experimental.pallas import tpu as pltpu


def _round_up(a, m):
    return ((a + m - 1) // m) * m


def _make_kernel(n):
    """Build the fused kernel for state dimension n (static)."""
    pairs = [(k, j) for k in range(n) for j in range(k, n)]
    off_vlin = 1
    off_vquad = 1 + n
    off_q = 1 + 2 * n
    off_rq = off_q + len(pairs)
    off_lam = off_rq + n

    def kernel(x_ref, p_ref, o_ref):
        # x_ref: (n, 8, TW) VMEM, batch on (sublanes, lanes); p_ref: packed SMEM scalars.
        xs = [x_ref[j] for j in range(n)]          # each (8, TW) full-vreg slab
        xsqs = [xj * xj for xj in xs]              # x_j^2

        sum_x = xs[0]
        sum_xsq = xsqs[0]
        for j in range(1, n):
            sum_x = sum_x + xs[j]
            sum_xsq = sum_xsq + xsqs[j]

        # Controller u = fun_(x) @ v = v0 + sum_j (v_lin_j x_j + v_quad_j x_j^2).
        u = p_ref[off_vlin] * xs[0] + p_ref[off_vquad] * xsqs[0] + p_ref[0]
        for j in range(1, n):
            u = u + p_ref[off_vlin + j] * xs[j] + p_ref[off_vquad + j] * xsqs[j]

        # y = sum_j der_j * partial_j with der_j = sum_k A[k,j] x_k + 0.2 u and
        # partial_j = 2 x_j + 0.25, regrouped as:
        #   y = sum_{k<=j} Q[k,j] x_k x_j  +  0.25 * sum_k rowsumA_k x_k
        #       + 0.2 u (2 sum_j x_j + 0.25 n)
        # (Q, rowsum precomputed host-side and packed into p_ref.)
        y = None
        for idx, (k, j) in enumerate(pairs):
            term = xsqs[k] if j == k else xs[k] * xs[j]
            t = p_ref[off_q + idx] * term
            y = t if y is None else y + t
        for k in range(n):
            y = y + p_ref[off_rq + k] * xs[k]
        y = y + (0.2 * u) * (2.0 * sum_x + 0.25 * n)

        # barrier b(x) = 1 - sum_j x_j^2 ; result = y - lam * b
        lam = p_ref[off_lam]
        o_ref[...] = y - lam + lam * sum_xsq

    return kernel


def _pack_params(v, A, lam, n):
    """Pack [v0, v_lin, v_quad, Q (upper-tri), 0.25*rowsum(A), lam] into one f32 array."""
    v_flat = v.reshape(-1).astype(jnp.float32)
    A = A.astype(jnp.float32)
    pairs = [(k, j) for k in range(n) for j in range(k, n)]
    q = jnp.stack([2.0 * A[k, k] if j == k else 2.0 * (A[k, j] + A[j, k])
                   for (k, j) in pairs])
    rq = 0.25 * jnp.sum(A, axis=1)
    lam = jnp.asarray(lam, jnp.float32).reshape(-1)[:1]
    return jnp.concatenate([v_flat[:1 + 2 * n], q, rq, lam]).astype(jnp.float32)


def finetune_forward(x, v, A, lam, *, max_tw=8192):
    """Pallas forward: x (B, N), v (M, 1), A (N, N), lam (1,) -> (B,)."""
    B, n = x.shape
    M = v.shape[0]
    assert M == 2 * n + 1, (M, n)

    params = _pack_params(v, A, lam, n)

    # Batch -> (8 sublanes, W lanes). Single full-array tile for small batches
    # (no (8,128) divisibility needed when block == array dims); otherwise a
    # 128-aligned lane tile chosen so the grid has >= 2 steps (v7x has 2 TCs).
    w_needed = pl.cdiv(B, 8)
    if w_needed <= 1024:
        tw = w_needed
    else:
        tw = min(_round_up(pl.cdiv(w_needed, 2), 128), max_tw)
    wp = _round_up(w_needed, tw)
    bp = 8 * wp
    grid = (wp // tw,)

    # Layout pass: pad + transpose + reshape fuse into one XLA copy.
    xt = x.astype(jnp.float32)
    if bp != B:
        xt = jnp.pad(xt, ((0, bp - B), (0, 0)))      # zero rows, sliced off below
    xt = xt.T.reshape(n, 8, wp)                      # element (j, s, w) = x[s*wp + w, j]

    # 2 pipeline buffers * (input + output) blocks, with headroom for intermediates.
    vmem_bytes = 4 * (n + 1) * (8 * tw * 4)
    vmem_bytes = min(48 << 20, max(vmem_bytes, 16 << 20))

    out = pl.pallas_call(
        _make_kernel(n),
        out_shape=jax.ShapeDtypeStruct((8, wp), jnp.float32),
        grid=grid,
        in_specs=[
            pl.BlockSpec((n, 8, tw), lambda i: (0, 0, i)),          # x tiles
            pl.BlockSpec(memory_space=pltpu.MemorySpace.SMEM),      # packed params
        ],
        out_specs=pl.BlockSpec((8, tw), lambda i: (0, i)),          # sublane+lane dense
        compiler_params=pltpu.CompilerParams(
            dimension_semantics=("parallel",),
            vmem_limit_bytes=vmem_bytes),
    )(xt, params)
    return out.reshape(bp)[:B]


def finetune_reference(x, v, A, lam):
    """Pure-JAX reference mirroring the torch forward."""
    B, _ = x.shape
    ans = jnp.concatenate([jnp.ones((B, 1), jnp.float32), x, x * x], axis=1)
    u = ans @ v                                   # (B, 1)
    partial = 2.0 * x + 0.25                      # (B, N)
    der = x @ A + 0.2 * u                         # (B, N)
    y = jnp.sum(der * partial, axis=1)            # (B,)
    b = 1.0 - jnp.sum(x * x, axis=1)              # (B,)
    return y - lam * b


if __name__ == "__main__":
    N = 4                     # state dim
    M = 2 * N + 1             # number of basis functions in lam_sp

    key = jax.random.PRNGKey(0)
    kx, kv, ka = jax.random.split(key, 3)
    # Deterministic parameter init (module __init__: v -> (M, 1) parameter, lam -> "mul")
    v = 0.1 * jax.random.normal(kv, (M, 1), dtype=jnp.float32)
    A = 0.3 * jax.random.normal(ka, (N, N), dtype=jnp.float32)
    lam = jnp.array([0.5], dtype=jnp.float32)

    for B in (16, 200):       # small batch + a ragged batch (exercises the pad path)
        x = jax.random.normal(jax.random.fold_in(kx, B), (B, N), dtype=jnp.float32)
        out = jax.block_until_ready(finetune_forward(x, v, A, lam))
        ref = finetune_reference(x, v, A, lam[0])
        assert out.shape == (B,), out.shape
        assert jnp.allclose(out, ref, atol=1e-4, rtol=1e-4), (B, out, ref)

    print("KERNEL_OK")
</pallas_src>

<mosaic_0001>
module attributes {stable_mosaic.version = 11 : i64} {
  func.func @kernel(%arg0: i32, %arg1: memref<4x8x2xf32, #tpu.memory_space<vmem>>, %arg2: memref<24xf32, #tpu.memory_space<smem>>, %arg3: memref<8x2xf32, #tpu.memory_space<vmem>>) attributes {dimension_semantics = [#tpu.dimension_semantics<parallel>], iteration_bounds = array<i64: 1>, scalar_prefetch = 0 : i64, scratch_operands = 0 : i64, tpu.core_type = #tpu.core_type<tc>, window_params = [{transform_indices = @transform_0, window_bounds = array<i64: 4, 8, 2>}, {transform_indices = @transform_1, window_bounds = array<i64: 24>}, {transform_indices = @transform_2, window_bounds = array<i64: 8, 2>}]} {
    %c0 = arith.constant 0 : index
    %c0_0 = arith.constant 0 : index
    %c0_1 = arith.constant 0 : index
    %0 = vector.load %arg1[%c0, %c0_0, %c0_1] : memref<4x8x2xf32, #tpu.memory_space<vmem>>, vector<1x8x2xf32>
    %1 = vector.shape_cast %0 : vector<1x8x2xf32> to vector<8x2xf32>
    %c1 = arith.constant 1 : index
    %c0_2 = arith.constant 0 : index
    %c0_3 = arith.constant 0 : index
    %2 = vector.load %arg1[%c1, %c0_2, %c0_3] : memref<4x8x2xf32, #tpu.memory_space<vmem>>, vector<1x8x2xf32>
    %3 = vector.shape_cast %2 : vector<1x8x2xf32> to vector<8x2xf32>
    %c2 = arith.constant 2 : index
    %c0_4 = arith.constant 0 : index
    %c0_5 = arith.constant 0 : index
    %4 = vector.load %arg1[%c2, %c0_4, %c0_5] : memref<4x8x2xf32, #tpu.memory_space<vmem>>, vector<1x8x2xf32>
    %5 = vector.shape_cast %4 : vector<1x8x2xf32> to vector<8x2xf32>
    %c3 = arith.constant 3 : index
    %c0_6 = arith.constant 0 : index
    %c0_7 = arith.constant 0 : index
    %6 = vector.load %arg1[%c3, %c0_6, %c0_7] : memref<4x8x2xf32, #tpu.memory_space<vmem>>, vector<1x8x2xf32>
    %7 = vector.shape_cast %6 : vector<1x8x2xf32> to vector<8x2xf32>
    %8 = arith.mulf %1, %1 : vector<8x2xf32>
    %9 = arith.mulf %3, %3 : vector<8x2xf32>
    %10 = arith.mulf %5, %5 : vector<8x2xf32>
    %11 = arith.mulf %7, %7 : vector<8x2xf32>
    %12 = arith.addf %1, %3 : vector<8x2xf32>
    %13 = arith.addf %8, %9 : vector<8x2xf32>
    %14 = arith.addf %12, %5 : vector<8x2xf32>
    %15 = arith.addf %13, %10 : vector<8x2xf32>
    %16 = arith.addf %14, %7 : vector<8x2xf32>
    %17 = arith.addf %15, %11 : vector<8x2xf32>
    %c1_8 = arith.constant 1 : index
    %18 = memref.load %arg2[%c1_8] : memref<24xf32, #tpu.memory_space<smem>>
    %19 = vector.broadcast %18 : f32 to vector<8x2xf32>
    %20 = arith.mulf %19, %1 : vector<8x2xf32>
    %c5 = arith.constant 5 : index
    %21 = memref.load %arg2[%c5] : memref<24xf32, #tpu.memory_space<smem>>
    %22 = vector.broadcast %21 : f32 to vector<8x2xf32>
    %23 = arith.mulf %22, %8 : vector<8x2xf32>
    %24 = arith.addf %20, %23 : vector<8x2xf32>
    %c0_9 = arith.constant 0 : index
    %25 = memref.load %arg2[%c0_9] : memref<24xf32, #tpu.memory_space<smem>>
    %26 = vector.broadcast %25 : f32 to vector<8x2xf32>
    %27 = arith.addf %24, %26 : vector<8x2xf32>
    %c2_10 = arith.constant 2 : index
    %28 = memref.load %arg2[%c2_10] : memref<24xf32, #tpu.memory_space<smem>>
    %29 = vector.broadcast %28 : f32 to vector<8x2xf32>
    %30 = arith.mulf %29, %3 : vector<8x2xf32>
    %31 = arith.addf %27, %30 : vector<8x2xf32>
    %c6 = arith.constant 6 : index
    %32 = memref.load %arg2[%c6] : memref<24xf32, #tpu.memory_space<smem>>
    %33 = vector.broadcast %32 : f32 to vector<8x2xf32>
    %34 = arith.mulf %33, %9 : vector<8x2xf32>
    %35 = arith.addf %31, %34 : vector<8x2xf32>
    %c3_11 = arith.constant 3 : index
    %36 = memref.load %arg2[%c3_11] : memref<24xf32, #tpu.memory_space<smem>>
    %37 = vector.broadcast %36 : f32 to vector<8x2xf32>
    %38 = arith.mulf %37, %5 : vector<8x2xf32>
    %39 = arith.addf %35, %38 : vector<8x2xf32>
    %c7 = arith.constant 7 : index
    %40 = memref.load %arg2[%c7] : memref<24xf32, #tpu.memory_space<smem>>
    %41 = vector.broadcast %40 : f32 to vector<8x2xf32>
    %42 = arith.mulf %41, %10 : vector<8x2xf32>
    %43 = arith.addf %39, %42 : vector<8x2xf32>
    %c4 = arith.constant 4 : index
    %44 = memref.load %arg2[%c4] : memref<24xf32, #tpu.memory_space<smem>>
    %45 = vector.broadcast %44 : f32 to vector<8x2xf32>
    %46 = arith.mulf %45, %7 : vector<8x2xf32>
    %47 = arith.addf %43, %46 : vector<8x2xf32>
    %c8 = arith.constant 8 : index
    %48 = memref.load %arg2[%c8] : memref<24xf32, #tpu.memory_space<smem>>
    %49 = vector.broadcast %48 : f32 to vector<8x2xf32>
    %50 = arith.mulf %49, %11 : vector<8x2xf32>
    %51 = arith.addf %47, %50 : vector<8x2xf32>
    %c9 = arith.constant 9 : index
    %52 = memref.load %arg2[%c9] : memref<24xf32, #tpu.memory_space<smem>>
    %53 = vector.broadcast %52 : f32 to vector<8x2xf32>
    %54 = arith.mulf %53, %8 : vector<8x2xf32>
    %55 = arith.mulf %1, %3 : vector<8x2xf32>
    %c10 = arith.constant 10 : index
    %56 = memref.load %arg2[%c10] : memref<24xf32, #tpu.memory_space<smem>>
    %57 = vector.broadcast %56 : f32 to vector<8x2xf32>
    %58 = arith.mulf %57, %55 : vector<8x2xf32>
    %59 = arith.addf %54, %58 : vector<8x2xf32>
    %60 = arith.mulf %1, %5 : vector<8x2xf32>
    %c11 = arith.constant 11 : index
    %61 = memref.load %arg2[%c11] : memref<24xf32, #tpu.memory_space<smem>>
    %62 = vector.broadcast %61 : f32 to vector<8x2xf32>
    %63 = arith.mulf %62, %60 : vector<8x2xf32>
    %64 = arith.addf %59, %63 : vector<8x2xf32>
    %65 = arith.mulf %1, %7 : vector<8x2xf32>
    %c12 = arith.constant 12 : index
    %66 = memref.load %arg2[%c12] : memref<24xf32, #tpu.memory_space<smem>>
    %67 = vector.broadcast %66 : f32 to vector<8x2xf32>
    %68 = arith.mulf %67, %65 : vector<8x2xf32>
    %69 = arith.addf %64, %68 : vector<8x2xf32>
    %c13 = arith.constant 13 : index
    %70 = memref.load %arg2[%c13] : memref<24xf32, #tpu.memory_space<smem>>
    %71 = vector.broadcast %70 : f32 to vector<8x2xf32>
    %72 = arith.mulf %71, %9 : vector<8x2xf32>
    %73 = arith.addf %69, %72 : vector<8x2xf32>
    %74 = arith.mulf %3, %5 : vector<8x2xf32>
    %c14 = arith.constant 14 : index
    %75 = memref.load %arg2[%c14] : memref<24xf32, #tpu.memory_space<smem>>
    %76 = vector.broadcast %75 : f32 to vector<8x2xf32>
    %77 = arith.mulf %76, %74 : vector<8x2xf32>
    %78 = arith.addf %73, %77 : vector<8x2xf32>
    %79 = arith.mulf %3, %7 : vector<8x2xf32>
    %c15 = arith.constant 15 : index
    %80 = memref.load %arg2[%c15] : memref<24xf32, #tpu.memory_space<smem>>
    %81 = vector.broadcast %80 : f32 to vector<8x2xf32>
    %82 = arith.mulf %81, %79 : vector<8x2xf32>
    %83 = arith.addf %78, %82 : vector<8x2xf32>
    %c16 = arith.constant 16 : index
    %84 = memref.load %arg2[%c16] : memref<24xf32, #tpu.memory_space<smem>>
    %85 = vector.broadcast %84 : f32 to vector<8x2xf32>
    %86 = arith.mulf %85, %10 : vector<8x2xf32>
    %87 = arith.addf %83, %86 : vector<8x2xf32>
    %88 = arith.mulf %5, %7 : vector<8x2xf32>
    %c17 = arith.constant 17 : index
    %89 = memref.load %arg2[%c17] : memref<24xf32, #tpu.memory_space<smem>>
    %90 = vector.broadcast %89 : f32 to vector<8x2xf32>
    %91 = arith.mulf %90, %88 : vector<8x2xf32>
    %92 = arith.addf %87, %91 : vector<8x2xf32>
    %c18 = arith.constant 18 : index
    %93 = memref.load %arg2[%c18] : memref<24xf32, #tpu.memory_space<smem>>
    %94 = vector.broadcast %93 : f32 to vector<8x2xf32>
    %95 = arith.mulf %94, %11 : vector<8x2xf32>
    %96 = arith.addf %92, %95 : vector<8x2xf32>
    %c19 = arith.constant 19 : index
    %97 = memref.load %arg2[%c19] : memref<24xf32, #tpu.memory_space<smem>>
    %98 = vector.broadcast %97 : f32 to vector<8x2xf32>
    %99 = arith.mulf %98, %1 : vector<8x2xf32>
    %100 = arith.addf %96, %99 : vector<8x2xf32>
    %c20 = arith.constant 20 : index
    %101 = memref.load %arg2[%c20] : memref<24xf32, #tpu.memory_space<smem>>
    %102 = vector.broadcast %101 : f32 to vector<8x2xf32>
    %103 = arith.mulf %102, %3 : vector<8x2xf32>
    %104 = arith.addf %100, %103 : vector<8x2xf32>
    %c21 = arith.constant 21 : index
    %105 = memref.load %arg2[%c21] : memref<24xf32, #tpu.memory_space<smem>>
    %106 = vector.broadcast %105 : f32 to vector<8x2xf32>
    %107 = arith.mulf %106, %5 : vector<8x2xf32>
    %108 = arith.addf %104, %107 : vector<8x2xf32>
    %c22 = arith.constant 22 : index
    %109 = memref.load %arg2[%c22] : memref<24xf32, #tpu.memory_space<smem>>
    %110 = vector.broadcast %109 : f32 to vector<8x2xf32>
    %111 = arith.mulf %110, %7 : vector<8x2xf32>
    %112 = arith.addf %108, %111 : vector<8x2xf32>
    %cst = arith.constant 2.000000e-01 : f32
    %113 = vector.broadcast %cst : f32 to vector<8x2xf32>
    %114 = arith.mulf %113, %51 : vector<8x2xf32>
    %cst_12 = arith.constant 2.000000e+00 : f32
    %115 = vector.broadcast %cst_12 : f32 to vector<8x2xf32>
    %116 = arith.mulf %115, %16 : vector<8x2xf32>
    %cst_13 = arith.constant 1.000000e+00 : f32
    %117 = vector.broadcast %cst_13 : f32 to vector<8x2xf32>
    %118 = arith.addf %116, %117 : vector<8x2xf32>
    %119 = arith.mulf %114, %118 : vector<8x2xf32>
    %120 = arith.addf %112, %119 : vector<8x2xf32>
    %c23 = arith.constant 23 : index
    %121 = memref.load %arg2[%c23] : memref<24xf32, #tpu.memory_space<smem>>
    %122 = vector.broadcast %121 : f32 to vector<8x2xf32>
    %123 = arith.subf %120, %122 : vector<8x2xf32>
    %124 = vector.broadcast %121 : f32 to vector<8x2xf32>
    %125 = arith.mulf %124, %17 : vector<8x2xf32>
    %126 = arith.addf %123, %125 : vector<8x2xf32>
    %c0_14 = arith.constant 0 : index
    %c0_15 = arith.constant 0 : index
    %127 = vector.load %arg3[%c0_14, %c0_15] : memref<8x2xf32, #tpu.memory_space<vmem>>, vector<8x2xf32>
    tpu.vector_store %arg3[%c0_14, %c0_15], %126 {strides = array<i32>} : memref<8x2xf32, #tpu.memory_space<vmem>>, vector<8x2xf32>,
    return
  }
  func.func @transform_0(%arg0: i32) -> (i32, i32, i32) {
    %c0_i32 = arith.constant 0 : i32
    %c0_i32_0 = arith.constant 0 : i32
    %c0_i32_1 = arith.constant 0 : i32
    return %c0_i32, %c0_i32_0, %arg0 : i32, i32, i32
  }
  func.func @transform_1(%arg0: i32) -> i32 {
    %c0_i32 = arith.constant 0 : i32
    %c0_i32_0 = arith.constant 0 : i32
    return %c0_i32 : i32
  }
  func.func @transform_2(%arg0: i32) -> (i32, i32) {
    %c0_i32 = arith.constant 0 : i32
    %c0_i32_0 = arith.constant 0 : i32
    return %c0_i32, %arg0 : i32, i32
  }
}

</mosaic_0001>

<bundles_post_ra>
// kernel: tpu_custom_call.1
= control target key start
LH: loop header
LB: loop body
LE: loop exit
PB: predicated region body
PF: predicated region fallthrough
CT: control target
= control target key end

     0   :  { %7 = vsyncpa [#allocation3], 0  ;;  %s334_s0 = inlined_call_operand.vmem [shape: f32[4,8,2], index: 0, kind: input, shape index: {}]   ;;  %s335_s1 = inlined_call_operand.vmem [shape: f32[24], index: 1, kind: input, shape index: {}]   ;;  %s336_s2 = inlined_call_operand.vmem [shape: f32[8,2], index: 2, kind: output, shape index: {}]  }
   0x1   :  { %s16_s11 = sshll.u32 %s335_s1, 4  ;;  %s17_s11 = int_to_ptr.vmem [resolvable:$true] %s16_s11 }
   0x2   :  { %s180_s12 = scalar_lea.vmem %s17_s11, 16  ;;  %p185_p1 = scmp.lt.s32.totalorder %s17_s11, %s17_s11 }
   0x3   :  { %p181_p0 = scmp.ne.s32.totalorder %s17_s11, %s180_s12  ;;  %p186_p2 = scmp.lt.s32.totalorder %s180_s12, %s180_s12 }
   0x5   :  { %p187_p3 = por %p186_p2, %p185_p1 }
   0x7   :  { %p188_p4 = pnand %p187_p3, %p181_p0 }
   0x9   :  { %191 = shalt.err (!%p188_p4)
}
   0xa   :  { %s194_s13 = smov [#allocation2]  }
   0xb   :  { %19 = dma.vmem_to_smem %s17_s11, 16, %s194_s13, [#allocation3]  }
   0xc   :  { %192 = dma.done.wait [#allocation3], 16  }
   0xd   :  { %193 = vsyncadd [#allocation3], 4294967280 }
   0xe   :  { %23 = sfence }
   0xf   :  { %s156_s14 = sld [smem:[#allocation2 + $0x1]]  ;;  %s157_s15 = sld [smem:[#allocation2 + $0x5]]  ;;  %v220_v0 = vld [vmem:[%s334_s0] sm:$0xff]  ;;  %v229_v1 = vld [vmem:[%s334_s0 + $0x8] sm:$0xff]  ;;  %v238_v2 = vld [vmem:[%s334_s0 + $0x10] sm:$0xff]  ;;  %vm146_vm0 = vcmask 15360  }
  0x10   :  { %s213_s16 = sld [smem:[#allocation2]]  ;;  %s158_s17 = sld [smem:[#allocation2 + $0x2]]  ;;  %v242_v3 = vmul.f32 %v220_v0, %v220_v0  ;;  %v251_v5 = vld [vmem:[%s334_s0 + $0x18] sm:$0xff]  ;;  %v78_v11 = vmul.f32 %v229_v1, %v220_v0  ;;  %v264_v12 = vmul.f32 %v229_v1, %v229_v1  ;;  %v268_v13 = vmul.f32 %v238_v2, %v238_v2 }
  0x11   :  { %s215_s18 = sld [smem:[#allocation2 + $0x6]]  ;;  %s222_s20 = sld [smem:[#allocation2 + $0x3]]  ;;  %v83_v15 = vmul.f32 %v238_v2, %v220_v0  ;;  %v88_v19 = vmul.f32 %v251_v5, %v220_v0  ;;  %v97_v23 = vmul.f32 %v238_v2, %v229_v1  ;;  %v35_v36 = vadd.f32 %v229_v1, %v220_v0 }
  0x12   :  { %s224_s21 = sld [smem:[#allocation2 + $0x7]]  ;;  %s231_s24 = sld [smem:[#allocation2 + $0x9]]  ;;  %v102_v38 = vmul.f32 %v251_v5, %v229_v1  ;;  %v111_v50 = vmul.f32 %v251_v5, %v238_v2  ;;  %v34_v57 = vmul.f32 %v251_v5, %v251_v5 }
  0x13   :  { %s233_s25 = sld [smem:[#allocation2 + $0xa]]  ;;  %s244_s28 = sld [smem:[#allocation2 + $0xb]]  ;;  %v37_v48 = vadd.f32 %v238_v2, %v35_v36 }
  0x14   :  { %s246_s29 = sld [smem:[#allocation2 + $0xc]]  ;;  %s254_s4 = sld [smem:[#allocation2 + $0xd]] }
  0x15   :  { %v42_v4 = vstv %s156_s14  ;;  %v45_v7 = vstv %s157_s15  ;;  %s256_s5 = sld [smem:[#allocation2 + $0xe]]  ;;  %s271_s0 = sld [smem:[#allocation2 + $0x4]]  ;;  %v39_v60 = vadd.f32 %v251_v5, %v37_v48 }
  0x16   :  { %v43_v6 = vmul.f32 %v42_v4, %v220_v0  ;;  %v46_v8 = vmul.f32 %v45_v7, %v242_v3  ;;  %v52_v9 = vstv %s158_s17  ;;  %v49_v14 = vstv %s213_s16  ;;  %s275_s6 = sld [smem:[#allocation2 + $0xf]]  ;;  %s286_s7 = sld [smem:[#allocation2 + $0x10]] }
  0x17   :  { %v56_v10 = vstv %s215_s18  ;;  %v53_v17 = vmul.f32 %v229_v1, %v52_v9  ;;  %v60_v18 = vstv %s222_s20  ;;  %s291_s8 = sld [smem:[#allocation2 + $0x8]]  ;;  %s296_s9 = sld [smem:[#allocation2 + $0x11]] }
  0x18   :  { %v47_v16 = vadd.f32 %v46_v8, %v43_v6  ;;  %v57_v20 = vmul.f32 %v56_v10, %v264_v12  ;;  %v76_v21 = vstv %s231_s24  ;;  %v64_v25 = vstv %s224_s21  ;;  %s303_s10 = sld [smem:[#allocation2 + $0x12]]  ;;  %s309_s11 = sld [smem:[#allocation2 + $0x13]] }
  0x19   :  { %v80_v22 = vstv %s233_s25  ;;  %v77_v26 = vmul.f32 %v76_v21, %v242_v3  ;;  %v61_v28 = vmul.f32 %v238_v2, %v60_v18  ;;  %v85_v29 = vstv %s244_s28  ;;  %s175_s12 = sld [smem:[#allocation2 + $0x14]]  ;;  %s176_s13 = sld [smem:[#allocation2 + $0x15]] }
  0x1a   :  { %v50_v24 = vadd.f32 %v49_v14, %v47_v16  ;;  %v81_v27 = vmul.f32 %v80_v22, %v78_v11  ;;  %v90_v30 = vstv %s246_s29  ;;  %v94_v31 = vstv %s254_s4  ;;  %s177_s14 = sld [smem:[#allocation2 + $0x16]]  ;;  %s178_s15 = sld [smem:[#allocation2 + $0x17]] }
  0x1b   :  { %v86_v34 = vmul.f32 %v85_v29, %v83_v15  ;;  %v91_v35 = vmul.f32 %v90_v30, %v88_v19  ;;  %v99_v37 = vstv %s256_s5  ;;  %v65_v40 = vmul.f32 %v64_v25, %v268_v13 }
  0x1c   :  { %v54_v32 = vadd.f32 %v53_v17, %v50_v24  ;;  %v82_v33 = vadd.f32 %v81_v27, %v77_v26  ;;  %v95_v42 = vmul.f32 %v94_v31, %v264_v12  ;;  %v68_v43 = vstv %s271_s0 }
  0x1d   :  { %v104_v44 = vstv %s275_s6  ;;  %v100_v47 = vmul.f32 %v99_v37, %v97_v23  ;;  %v108_v49 = vstv %s286_s7  ;;  %v69_v52 = vmul.f32 %v251_v5, %v68_v43 }
  0x1e   :  { %v58_v39 = vadd.f32 %v57_v20, %v54_v32  ;;  %v87_v41 = vadd.f32 %v86_v34, %v82_v33  ;;  %v105_v54 = vmul.f32 %v104_v44, %v102_v38  ;;  %v72_v55 = vstv %s291_s8 }
  0x1f   :  { %v113_v56 = vstv %s296_s9  ;;  %v109_v59 = vmul.f32 %v108_v49, %v268_v13  ;;  %v117_v61 = vstv %s303_s10  ;;  %v73_v63 = vmul.f32 %v72_v55, %v34_v57 }
  0x20   :  { %v62_v45 = vadd.f32 %v61_v28, %v58_v39  ;;  %v92_v46 = vadd.f32 %v91_v35, %v87_v41  ;;  %v114_v6 = vmul.f32 %v113_v56, %v111_v50  ;;  %v121_v7 = vstv %s309_s11 }
  0x21   :  { %v118_v9 = vmul.f32 %v117_v61, %v34_v57  ;;  %v36_v10 = vadd.f32 %v264_v12, %v242_v3  ;;  %v125_v11 = vstv %s175_s12  ;;  %v122_v16 = vmul.f32 %v121_v7, %v220_v0 }
  0x22   :  { %v66_v51 = vadd.f32 %v65_v40, %v62_v45  ;;  %v96_v53 = vadd.f32 %v95_v42, %v92_v46  ;;  %v137_v17 = vmul.f32 2.0, %v39_v60  ;;  %v129_v18 = vstv %s176_s13 }
  0x23   :  { %v126_v20 = vmul.f32 %v229_v1, %v125_v11  ;;  %v38_v21 = vadd.f32 %v36_v10, %v268_v13  ;;  %v133_v22 = vstv %s177_s14  ;;  %v130_v24 = vmul.f32 %v238_v2, %v129_v18 }
  0x24   :  { %v101_v58 = vadd.f32 %v100_v47, %v96_v53  ;;  %v70_v62 = vadd.f32 %v69_v52, %v66_v51  ;;  %v138_v26 = vadd.f32 1.0, %v137_v17  ;;  %v134_v12 = vmul.f32 %v251_v5, %v133_v22 }
  0x25   :  { %v40_v27 = vadd.f32 %v38_v21, %v34_v57  ;;  %v142_v29 = vstv %s178_s15 }
  0x26   :  { %v106_v4 = vadd.f32 %v105_v54, %v101_v58  ;;  %v74_v14 = vadd.f32 %v73_v63, %v70_v62 }
  0x27   :  { %v144_v32 = vmul.f32 %v142_v29, %v40_v27 }
  0x28   :  { %v110_v8 = vadd.f32 %v109_v59, %v106_v4  ;;  %v136_v25 = vmul.f32 0.2, %v74_v14 }
  0x2a   :  { %v115_v15 = vadd.f32 %v114_v6, %v110_v8  ;;  %v139_v0 = vmul.f32 %v138_v26, %v136_v25 }
  0x2c   :  { %v119_v19 = vadd.f32 %v118_v9, %v115_v15 }
  0x2e   :  { %v123_v23 = vadd.f32 %v122_v16, %v119_v19 }
  0x30   :  { %v127_v3 = vadd.f32 %v126_v20, %v123_v23 }
  0x32   :  { %v131_v28 = vadd.f32 %v130_v24, %v127_v3 }
  0x34   :  { %v135_v30 = vadd.f32 %v134_v12, %v131_v28 }
  0x36   :  { %v140_v31 = vadd.f32 %v139_v0, %v135_v30 }
  0x38   :  { %v143_v33 = vsub.f32 %v140_v31, %v142_v29 }
  0x3a   :  { %v145_v1 = vadd.f32 %v144_v32, %v143_v33 }
  0x3c   :  { %147 = vst.msk [vmem:[%s336_s2] sm:$0xff] %vm146_vm0, %v145_v1 }
  0x3d   :  { %152 = vsyncpa [#allocation3], 1 }

</bundles_post_ra>
